<compile_context>
chip_gen: v5e
topology: v5e:2x2
jax: 0.10.0
libtpu: 0.0.40
codegen_flags: <defaults>
</compile_context>

<pallas_src>
import jax
import jax.numpy as jnp
from jax.experimental import pallas as pl
from jax.experimental.pallas import tpu as pltpu


def reservoir_kernel(u_ref, x0_ref, win_t_ref, w_t_ref, lw_t_ref, lb_ref,
                     p_ref, xf_ref, pre_ref, states_ref):
    """Full ESN recurrence + readout, VMEM resident, single invocation.

    u_ref      : (B, I)   input signal
    x0_ref     : (1, S)   initial reservoir state
    win_t_ref  : (I, S)   input weights, transposed
    w_t_ref    : (S, S)   recurrent weights, transposed
    lw_t_ref   : (S, O)   readout (nn.Linear) weights, transposed
    lb_ref     : (1, O)   readout bias
    p_ref      : (B, O)   output p = ll(states)
    xf_ref     : (1, S)   final reservoir state
    pre_ref    : (B, S)   scratch: batched input projection u @ win^T
    states_ref : (B, S)   scratch: all reservoir states
    """
    batch = u_ref.shape[0]

    # (1) Batched input projection, off the serial chain:
    #     pre_in[t] = win @ u[t]  for all t at once.
    pre_ref[...] = jnp.dot(u_ref[...], win_t_ref[...],
                           preferred_element_type=jnp.float32)

    # Load the recurrent weight once; reused by every step.
    w_t = w_t_ref[...]                                    # (S, S)

    # (2) Strictly sequential recurrence.  `batch` is a static trace-time
    #     constant, so this Python loop is fully unrolled (equivalent to
    #     lax.fori_loop(..., unroll=True)): the state x stays in vregs, all
    #     slice indices are static, and the scheduler sees across steps.
    x = x0_ref[...]                                       # (1, S) in registers
    for t in range(batch):
        pre = pre_ref[pl.ds(t, 1), :] + jnp.dot(
            x, w_t, preferred_element_type=jnp.float32)   # (1, S)
        x = jnp.tanh(pre)
        states_ref[pl.ds(t, 1), :] = x                    # off the serial chain

    xf_ref[...] = x

    # (3) Batched readout after the loop: one (B, S) @ (S, O) matmul, one bias
    #     add, one store.
    p_ref[...] = (jnp.dot(states_ref[...], lw_t_ref[...],
                          preferred_element_type=jnp.float32)
                  + lb_ref[...]).astype(p_ref.dtype)


@jax.jit
def reservoir_forward(u, X, win, w, ll_weight, ll_bias):
    """Wrapper: layout glue (transposes, row-vector promotion) + pallas_call."""
    batch, in_f = u.shape
    size = w.shape[0]
    out_f = ll_weight.shape[0]

    win_t = win.T                      # (I, S)
    w_t = w.T                          # (S, S)
    lw_t = ll_weight.T                 # (S, O)
    x0 = X.reshape(1, size)
    lb = ll_bias.reshape(1, out_f)

    def vmem_spec():
        return pl.BlockSpec(memory_space=pltpu.MemorySpace.VMEM)

    p, xf = pl.pallas_call(
        reservoir_kernel,
        out_shape=(jax.ShapeDtypeStruct((batch, out_f), jnp.float32),
                   jax.ShapeDtypeStruct((1, size), jnp.float32)),
        # No grid: the recurrence is strictly sequential and everything fits in
        # VMEM; a grid would only add useless double-buffering.  (Do not try to
        # shard the time loop across v7x's two TensorCores — parallelize over
        # independent sequences instead if that capacity is ever needed.)
        in_specs=[vmem_spec() for _ in range(6)],
        out_specs=(vmem_spec(), vmem_spec()),
        scratch_shapes=[pltpu.VMEM((batch, size), jnp.float32),   # pre_in
                        pltpu.VMEM((batch, size), jnp.float32)],  # states
    )(u, x0, win_t, w_t, lw_t, lb)

    return p, xf.reshape(size)


def reservoir_forward_ref(u, X, win, w, ll_weight, ll_bias):
    """Plain-JAX reference matching the PyTorch forward (f32 throughout)."""
    def step(x, u_t):
        x_new = jnp.tanh(win @ u_t + w @ x)
        return x_new, x_new
    x_final, states = jax.lax.scan(step, X, u)
    p = states @ ll_weight.T + ll_bias
    return p, x_final


if __name__ == "__main__":
    # Small, TPU-friendly shapes consistent with the module.
    batch = 8             # u.size()[0] — also the recurrence length
    input_features = 8
    size = 128            # reservoir size
    output_features = 8

    key = jax.random.PRNGKey(0)
    k_u, k_win, k_w, k_lw, k_lb, k_wt = jax.random.split(key, 6)

    # Deterministic parameter init (mirrors torch shapes).
    u = jax.random.normal(k_u, (batch, input_features), dtype=jnp.float32)
    X = jnp.zeros((size,), dtype=jnp.float32)                       # initial state
    win = (jax.random.uniform(k_win, (size, input_features)) - 0.5) * 2.0
    w = (jax.random.uniform(k_w, (size, size)) - 0.5) * 2.0
    bound = 1.0 / jnp.sqrt(jnp.float32(size))
    ll_weight = jax.random.uniform(k_lw, (output_features, size),
                                   minval=-bound, maxval=bound).astype(jnp.float32)
    ll_bias = jax.random.uniform(k_lb, (output_features,),
                                 minval=-bound, maxval=bound).astype(jnp.float32)
    # self.weight (output_features,) exists in __init__ but is unused in forward.
    _unused_weight = jax.random.normal(k_wt, (output_features,), dtype=jnp.float32)

    p, x_final = reservoir_forward(u, X, win, w, ll_weight, ll_bias)
    p = jax.block_until_ready(p)
    x_final = jax.block_until_ready(x_final)

    # Correctness check against plain-JAX reference.
    p_ref, x_ref = reservoir_forward_ref(u, X, win, w, ll_weight, ll_bias)
    assert p.shape == (batch, output_features)
    assert x_final.shape == (size,)
    assert jnp.allclose(p, p_ref, atol=1e-2, rtol=1e-2)
    assert jnp.allclose(x_final, x_ref, atol=1e-2, rtol=1e-2)

    # TODO(synk): the torch module prints `states` inside forward; omitted here.
    print("KERNEL_OK")
</pallas_src>

<mosaic_0001>
module attributes {stable_mosaic.version = 11 : i64} {
  func.func @reservoir_kernel(%arg0: memref<8x8xf32, #tpu.memory_space<vmem>>, %arg1: memref<1x128xf32, #tpu.memory_space<vmem>>, %arg2: memref<8x128xf32, #tpu.memory_space<vmem>>, %arg3: memref<128x128xf32, #tpu.memory_space<vmem>>, %arg4: memref<128x8xf32, #tpu.memory_space<vmem>>, %arg5: memref<1x8xf32, #tpu.memory_space<vmem>>, %arg6: memref<8x8xf32, #tpu.memory_space<vmem>>, %arg7: memref<1x128xf32, #tpu.memory_space<vmem>>, %arg8: memref<8x128xf32, #tpu.memory_space<vmem>>, %arg9: memref<8x128xf32, #tpu.memory_space<vmem>>) attributes {dimension_semantics = [], scalar_prefetch = 0 : i64, scratch_operands = 2 : i64, tpu.core_type = #tpu.core_type<tc>} {
    %c0 = arith.constant 0 : index
    %c0_0 = arith.constant 0 : index
    %0 = vector.load %arg0[%c0, %c0_0] : memref<8x8xf32, #tpu.memory_space<vmem>>, vector<8x8xf32>
    %c0_1 = arith.constant 0 : index
    %c0_2 = arith.constant 0 : index
    %1 = vector.load %arg2[%c0_1, %c0_2] : memref<8x128xf32, #tpu.memory_space<vmem>>, vector<8x128xf32>
    %cst = arith.constant dense<0.000000e+00> : vector<8x128xf32>
    %2 = tpu.matmul %0, %1, %cst {dimension_numbers = #tpu.dot_dimension_numbers<[1], [0], [0], [1], [0, 0, 1, 1], [], []>} : vector<8x8xf32>, vector<8x128xf32>, vector<8x128xf32> -> vector<8x128xf32>
    %c0_3 = arith.constant 0 : index
    %c0_4 = arith.constant 0 : index
    %3 = vector.load %arg8[%c0_3, %c0_4] : memref<8x128xf32, #tpu.memory_space<vmem>>, vector<8x128xf32>
    tpu.vector_store %arg8[%c0_3, %c0_4], %2 {strides = array<i32>} : memref<8x128xf32, #tpu.memory_space<vmem>>, vector<8x128xf32>,
    %c0_5 = arith.constant 0 : index
    %c0_6 = arith.constant 0 : index
    %4 = vector.load %arg3[%c0_5, %c0_6] : memref<128x128xf32, #tpu.memory_space<vmem>>, vector<128x128xf32>
    %c0_7 = arith.constant 0 : index
    %c0_8 = arith.constant 0 : index
    %5 = vector.load %arg1[%c0_7, %c0_8] : memref<1x128xf32, #tpu.memory_space<vmem>>, vector<1x128xf32>
    %c0_9 = arith.constant 0 : index
    %c0_10 = arith.constant 0 : index
    %6 = vector.load %arg8[%c0_9, %c0_10] : memref<8x128xf32, #tpu.memory_space<vmem>>, vector<1x128xf32>
    %cst_11 = arith.constant dense<0.000000e+00> : vector<1x128xf32>
    %7 = tpu.matmul %5, %4, %cst_11 {dimension_numbers = #tpu.dot_dimension_numbers<[1], [0], [0], [1], [0, 0, 1, 1], [], []>} : vector<1x128xf32>, vector<128x128xf32>, vector<1x128xf32> -> vector<1x128xf32>
    %8 = arith.addf %6, %7 : vector<1x128xf32>
    %9 = math.tanh %8 : vector<1x128xf32>
    %c0_12 = arith.constant 0 : index
    %c0_13 = arith.constant 0 : index
    %10 = vector.load %arg9[%c0_12, %c0_13] : memref<8x128xf32, #tpu.memory_space<vmem>>, vector<1x128xf32>
    tpu.vector_store %arg9[%c0_12, %c0_13], %9 {strides = array<i32>} : memref<8x128xf32, #tpu.memory_space<vmem>>, vector<1x128xf32>,
    %c1 = arith.constant 1 : index
    %c0_14 = arith.constant 0 : index
    %11 = vector.load %arg8[%c1, %c0_14] : memref<8x128xf32, #tpu.memory_space<vmem>>, vector<1x128xf32>
    %cst_15 = arith.constant dense<0.000000e+00> : vector<1x128xf32>
    %12 = tpu.matmul %9, %4, %cst_15 {dimension_numbers = #tpu.dot_dimension_numbers<[1], [0], [0], [1], [0, 0, 1, 1], [], []>} : vector<1x128xf32>, vector<128x128xf32>, vector<1x128xf32> -> vector<1x128xf32>
    %13 = arith.addf %11, %12 : vector<1x128xf32>
    %14 = math.tanh %13 : vector<1x128xf32>
    %c1_16 = arith.constant 1 : index
    %c0_17 = arith.constant 0 : index
    %15 = vector.load %arg9[%c1_16, %c0_17] : memref<8x128xf32, #tpu.memory_space<vmem>>, vector<1x128xf32>
    tpu.vector_store %arg9[%c1_16, %c0_17], %14 {strides = array<i32>} : memref<8x128xf32, #tpu.memory_space<vmem>>, vector<1x128xf32>,
    %c2 = arith.constant 2 : index
    %c0_18 = arith.constant 0 : index
    %16 = vector.load %arg8[%c2, %c0_18] : memref<8x128xf32, #tpu.memory_space<vmem>>, vector<1x128xf32>
    %cst_19 = arith.constant dense<0.000000e+00> : vector<1x128xf32>
    %17 = tpu.matmul %14, %4, %cst_19 {dimension_numbers = #tpu.dot_dimension_numbers<[1], [0], [0], [1], [0, 0, 1, 1], [], []>} : vector<1x128xf32>, vector<128x128xf32>, vector<1x128xf32> -> vector<1x128xf32>
    %18 = arith.addf %16, %17 : vector<1x128xf32>
    %19 = math.tanh %18 : vector<1x128xf32>
    %c2_20 = arith.constant 2 : index
    %c0_21 = arith.constant 0 : index
    %20 = vector.load %arg9[%c2_20, %c0_21] : memref<8x128xf32, #tpu.memory_space<vmem>>, vector<1x128xf32>
    tpu.vector_store %arg9[%c2_20, %c0_21], %19 {strides = array<i32>} : memref<8x128xf32, #tpu.memory_space<vmem>>, vector<1x128xf32>,
    %c3 = arith.constant 3 : index
    %c0_22 = arith.constant 0 : index
    %21 = vector.load %arg8[%c3, %c0_22] : memref<8x128xf32, #tpu.memory_space<vmem>>, vector<1x128xf32>
    %cst_23 = arith.constant dense<0.000000e+00> : vector<1x128xf32>
    %22 = tpu.matmul %19, %4, %cst_23 {dimension_numbers = #tpu.dot_dimension_numbers<[1], [0], [0], [1], [0, 0, 1, 1], [], []>} : vector<1x128xf32>, vector<128x128xf32>, vector<1x128xf32> -> vector<1x128xf32>
    %23 = arith.addf %21, %22 : vector<1x128xf32>
    %24 = math.tanh %23 : vector<1x128xf32>
    %c3_24 = arith.constant 3 : index
    %c0_25 = arith.constant 0 : index
    %25 = vector.load %arg9[%c3_24, %c0_25] : memref<8x128xf32, #tpu.memory_space<vmem>>, vector<1x128xf32>
    tpu.vector_store %arg9[%c3_24, %c0_25], %24 {strides = array<i32>} : memref<8x128xf32, #tpu.memory_space<vmem>>, vector<1x128xf32>,
    %c4 = arith.constant 4 : index
    %c0_26 = arith.constant 0 : index
    %26 = vector.load %arg8[%c4, %c0_26] : memref<8x128xf32, #tpu.memory_space<vmem>>, vector<1x128xf32>
    %cst_27 = arith.constant dense<0.000000e+00> : vector<1x128xf32>
    %27 = tpu.matmul %24, %4, %cst_27 {dimension_numbers = #tpu.dot_dimension_numbers<[1], [0], [0], [1], [0, 0, 1, 1], [], []>} : vector<1x128xf32>, vector<128x128xf32>, vector<1x128xf32> -> vector<1x128xf32>
    %28 = arith.addf %26, %27 : vector<1x128xf32>
    %29 = math.tanh %28 : vector<1x128xf32>
    %c4_28 = arith.constant 4 : index
    %c0_29 = arith.constant 0 : index
    %30 = vector.load %arg9[%c4_28, %c0_29] : memref<8x128xf32, #tpu.memory_space<vmem>>, vector<1x128xf32>
    tpu.vector_store %arg9[%c4_28, %c0_29], %29 {strides = array<i32>} : memref<8x128xf32, #tpu.memory_space<vmem>>, vector<1x128xf32>,
    %c5 = arith.constant 5 : index
    %c0_30 = arith.constant 0 : index
    %31 = vector.load %arg8[%c5, %c0_30] : memref<8x128xf32, #tpu.memory_space<vmem>>, vector<1x128xf32>
    %cst_31 = arith.constant dense<0.000000e+00> : vector<1x128xf32>
    %32 = tpu.matmul %29, %4, %cst_31 {dimension_numbers = #tpu.dot_dimension_numbers<[1], [0], [0], [1], [0, 0, 1, 1], [], []>} : vector<1x128xf32>, vector<128x128xf32>, vector<1x128xf32> -> vector<1x128xf32>
    %33 = arith.addf %31, %32 : vector<1x128xf32>
    %34 = math.tanh %33 : vector<1x128xf32>
    %c5_32 = arith.constant 5 : index
    %c0_33 = arith.constant 0 : index
    %35 = vector.load %arg9[%c5_32, %c0_33] : memref<8x128xf32, #tpu.memory_space<vmem>>, vector<1x128xf32>
    tpu.vector_store %arg9[%c5_32, %c0_33], %34 {strides = array<i32>} : memref<8x128xf32, #tpu.memory_space<vmem>>, vector<1x128xf32>,
    %c6 = arith.constant 6 : index
    %c0_34 = arith.constant 0 : index
    %36 = vector.load %arg8[%c6, %c0_34] : memref<8x128xf32, #tpu.memory_space<vmem>>, vector<1x128xf32>
    %cst_35 = arith.constant dense<0.000000e+00> : vector<1x128xf32>
    %37 = tpu.matmul %34, %4, %cst_35 {dimension_numbers = #tpu.dot_dimension_numbers<[1], [0], [0], [1], [0, 0, 1, 1], [], []>} : vector<1x128xf32>, vector<128x128xf32>, vector<1x128xf32> -> vector<1x128xf32>
    %38 = arith.addf %36, %37 : vector<1x128xf32>
    %39 = math.tanh %38 : vector<1x128xf32>
    %c6_36 = arith.constant 6 : index
    %c0_37 = arith.constant 0 : index
    %40 = vector.load %arg9[%c6_36, %c0_37] : memref<8x128xf32, #tpu.memory_space<vmem>>, vector<1x128xf32>
    tpu.vector_store %arg9[%c6_36, %c0_37], %39 {strides = array<i32>} : memref<8x128xf32, #tpu.memory_space<vmem>>, vector<1x128xf32>,
    %c7 = arith.constant 7 : index
    %c0_38 = arith.constant 0 : index
    %41 = vector.load %arg8[%c7, %c0_38] : memref<8x128xf32, #tpu.memory_space<vmem>>, vector<1x128xf32>
    %cst_39 = arith.constant dense<0.000000e+00> : vector<1x128xf32>
    %42 = tpu.matmul %39, %4, %cst_39 {dimension_numbers = #tpu.dot_dimension_numbers<[1], [0], [0], [1], [0, 0, 1, 1], [], []>} : vector<1x128xf32>, vector<128x128xf32>, vector<1x128xf32> -> vector<1x128xf32>
    %43 = arith.addf %41, %42 : vector<1x128xf32>
    %44 = math.tanh %43 : vector<1x128xf32>
    %c7_40 = arith.constant 7 : index
    %c0_41 = arith.constant 0 : index
    %45 = vector.load %arg9[%c7_40, %c0_41] : memref<8x128xf32, #tpu.memory_space<vmem>>, vector<1x128xf32>
    tpu.vector_store %arg9[%c7_40, %c0_41], %44 {strides = array<i32>} : memref<8x128xf32, #tpu.memory_space<vmem>>, vector<1x128xf32>,
    %c0_42 = arith.constant 0 : index
    %c0_43 = arith.constant 0 : index
    %46 = vector.load %arg7[%c0_42, %c0_43] : memref<1x128xf32, #tpu.memory_space<vmem>>, vector<1x128xf32>
    tpu.vector_store %arg7[%c0_42, %c0_43], %44 {strides = array<i32>} : memref<1x128xf32, #tpu.memory_space<vmem>>, vector<1x128xf32>,
    %c0_44 = arith.constant 0 : index
    %c0_45 = arith.constant 0 : index
    %47 = vector.load %arg9[%c0_44, %c0_45] : memref<8x128xf32, #tpu.memory_space<vmem>>, vector<8x128xf32>
    %c0_46 = arith.constant 0 : index
    %c0_47 = arith.constant 0 : index
    %48 = vector.load %arg4[%c0_46, %c0_47] : memref<128x8xf32, #tpu.memory_space<vmem>>, vector<128x8xf32>
    %cst_48 = arith.constant dense<0.000000e+00> : vector<8x8xf32>
    %49 = tpu.matmul %47, %48, %cst_48 {dimension_numbers = #tpu.dot_dimension_numbers<[1], [0], [0], [1], [0, 0, 1, 1], [], []>} : vector<8x128xf32>, vector<128x8xf32>, vector<8x8xf32> -> vector<8x8xf32>
    %c0_49 = arith.constant 0 : index
    %c0_50 = arith.constant 0 : index
    %50 = vector.load %arg5[%c0_49, %c0_50] : memref<1x8xf32, #tpu.memory_space<vmem>>, vector<1x8xf32>
    %51 = vector.broadcast %50 : vector<1x8xf32> to vector<8x8xf32>
    %52 = arith.addf %49, %51 : vector<8x8xf32>
    %c0_51 = arith.constant 0 : index
    %c0_52 = arith.constant 0 : index
    %53 = vector.load %arg6[%c0_51, %c0_52] : memref<8x8xf32, #tpu.memory_space<vmem>>, vector<8x8xf32>
    tpu.vector_store %arg6[%c0_51, %c0_52], %52 {strides = array<i32>} : memref<8x8xf32, #tpu.memory_space<vmem>>, vector<8x8xf32>,
    return
  }
}

</mosaic_0001>

<bundles_post_ra>
// kernel: reservoir_forward.1
= control target key start
LH: loop header
LB: loop body
LE: loop exit
PB: predicated region body
PF: predicated region fallthrough
CT: control target
= control target key end

     0   :  { %13 = vsyncpa [#allocation5], 0  ;;  %vm29_vm0 = vcmask 64512   ;;  %s728_s0 = inlined_call_operand.vmem [shape: f32[8,8], index: 0, kind: input, shape index: {}]   ;;  %s729_s1 = inlined_call_operand.vmem [shape: f32[1,128], index: 1, kind: input, shape index: {}]   ;;  %s730_s2 = inlined_call_operand.vmem [shape: f32[8,128], index: 2, kind: input, shape index: {}]   ;;  %s731_s3 = inlined_call_operand.vmem [shape: f32[128,128], index: 3, kind: input, shape index: {}]   ;;  %s732_s4 = inlined_call_operand.vmem [shape: f32[128,8], index: 4, kind: input, shape index: {}]   ;;  %s733_s5 = inlined_call_operand.vmem [shape: f32[1,8], index: 5, kind: input, shape index: {}]   ;;  %s734_s6 = inlined_call_operand.hbm [shape: f32[8,8], index: 6, kind: output, shape index: {0}]   ;;  %s735_s7 = inlined_call_operand.hbm [shape: f32[1,128], index: 7, kind: output, shape index: {1}]  }
   0x1   :  { %v455_v0 = vld [vmem:[%s731_s3 + $0x78] sm:$0xff]  ;;  %v460_v1 = vld [vmem:[%s731_s3 + $0x70] sm:$0xff]  ;;  %v467_v2 = vld [vmem:[%s731_s3 + $0x68] sm:$0xff] }
   0x2   :  { %72 = vmatpush.msra.mxu1 %v455_v0  ;;  %96 = vmatpush.msra.mxu2 %v455_v0  ;;  %v28_v3 = vld [vmem:[%s730_s2] sm:$0xff]  ;;  %v489_v6 = vld [vmem:[%s731_s3 + $0x58] sm:$0xff] }
   0x3   :  { %120 = vmatpush.msra.mxu3 %v455_v0  ;;  %v478_v4 = vld [vmem:[%s731_s3 + $0x60] sm:$0xff]  ;;  %48 = vmatpush.msra.mxu0 %v28_v3 }
   0x4   :  { %73 = vmatpush.msra.mxu1 %v460_v1  ;;  %97 = vmatpush.msra.mxu2 %v460_v1  ;;  %v27_v5 = vld [vmem:[%s728_s0] sm:$0xff] }
   0x5   :  { %121 = vmatpush.msra.mxu3 %v460_v1  ;;  %338 = vmatmul.msk.f32.vlgmr.msra.gmra.mxu0 %vm29_vm0, %v27_v5 }
   0x6   :  { %74 = vmatpush.msra.mxu1 %v467_v2  ;;  %98 = vmatpush.msra.mxu2 %v467_v2 }
   0x7   :  { %122 = vmatpush.msra.mxu3 %v467_v2 }
   0x8   :  { %14 = vsyncpa [#allocation7], 0  ;;  %75 = vmatpush.msra.mxu1 %v478_v4  ;;  %144 = vmatpush.msrb.mxu0 %v455_v0  ;;  %v498_v7 = vld [vmem:[%s731_s3 + $0x50] sm:$0xff]  ;;  %v507_v8 = vld [vmem:[%s731_s3 + $0x48] sm:$0xff]  ;;  %s410_s15 = smov [#allocation6]   ;;  %s324_s19 = sshll.u32 %s735_s7, 4  ;;  %s325_s19 = int_to_ptr.hbm [resolvable:$true] %s324_s19 }
   0x9   :  { %99 = vmatpush.msra.mxu2 %v478_v4  ;;  %123 = vmatpush.msra.mxu3 %v478_v4  ;;  %v516_v9 = vld [vmem:[%s731_s3 + $0x40] sm:$0xff]  ;;  %v525_v10 = vld [vmem:[%s731_s3 + $0x38] sm:$0xff]  ;;  %v534_v11 = vld [vmem:[%s731_s3 + $0x30] sm:$0xff]  ;;  %s322_s16 = sshll.u32 %s410_s15, 4  ;;  %s411_s21 = smov [#allocation4]   ;;  %s323_s16 = int_to_ptr.vmem [resolvable:$true] %s322_s16 }
   0xa   :  { %76 = vmatpush.msra.mxu1 %v489_v6  ;;  %145 = vmatpush.msrb.mxu0 %v460_v1  ;;  %v543_v12 = vld [vmem:[%s731_s3 + $0x28] sm:$0xff]  ;;  %v552_v13 = vld [vmem:[%s731_s3 + $0x20] sm:$0xff]  ;;  %v561_v14 = vld [vmem:[%s731_s3 + $0x18] sm:$0xff]  ;;  %s311_s22 = sshll.u32 %s411_s21, 4  ;;  %s313_s25 = sshll.u32 %s734_s6, 4  ;;  %s312_s22 = int_to_ptr.vmem [resolvable:$true] %s311_s22  ;;  %s314_s25 = int_to_ptr.hbm [resolvable:$true] %s313_s25 }
   0xb   :  { %100 = vmatpush.msra.mxu2 %v489_v6  ;;  %124 = vmatpush.msra.mxu3 %v489_v6  ;;  %v570_v15 = vld [vmem:[%s731_s3 + $0x10] sm:$0xff]  ;;  %v579_v16 = vld [vmem:[%s731_s3 + $0x8] sm:$0xff]  ;;  %v588_v17 = vld [vmem:[%s731_s3] sm:$0xff] }
   0xc   :  { %77 = vmatpush.msra.mxu1 %v498_v7  ;;  %146 = vmatpush.msrb.mxu0 %v467_v2  ;;  %v70_v18 = vld [vmem:[%s729_s1] sm:$0x1]  ;;  %v280_v44 = vld [vmem:[%s732_s4 + $0x78] sm:$0xff]  ;;  %v279_v45 = vld [vmem:[%s732_s4 + $0x70] sm:$0xff] }
   0xd   :  { %101 = vmatpush.msra.mxu2 %v498_v7  ;;  %125 = vmatpush.msra.mxu3 %v498_v7  ;;  %v278_v46 = vld [vmem:[%s732_s4 + $0x68] sm:$0xff]  ;;  %v277_v47 = vld [vmem:[%s732_s4 + $0x60] sm:$0xff]  ;;  %v276_v48 = vld [vmem:[%s732_s4 + $0x58] sm:$0xff] }
   0xe   :  { %78 = vmatpush.msra.mxu1 %v507_v8  ;;  %147 = vmatpush.msrb.mxu0 %v478_v4  ;;  %v275_v49 = vld [vmem:[%s732_s4 + $0x50] sm:$0xff]  ;;  %v274_v50 = vld [vmem:[%s732_s4 + $0x48] sm:$0xff]  ;;  %v273_v55 = vld [vmem:[%s732_s4 + $0x40] sm:$0xff] }
   0xf   :  { %102 = vmatpush.msra.mxu2 %v507_v8  ;;  %126 = vmatpush.msra.mxu3 %v507_v8  ;;  %v272_v56 = vld [vmem:[%s732_s4 + $0x38] sm:$0xff]  ;;  %v271_v57 = vld [vmem:[%s732_s4 + $0x30] sm:$0xff]  ;;  %v270_v58 = vld [vmem:[%s732_s4 + $0x28] sm:$0xff] }
  0x10   :  { %79 = vmatpush.msra.mxu1 %v516_v9  ;;  %148 = vmatpush.msrb.mxu0 %v489_v6  ;;  %v269_v59 = vld [vmem:[%s732_s4 + $0x20] sm:$0xff]  ;;  %v268_v60 = vld [vmem:[%s732_s4 + $0x18] sm:$0xff]  ;;  %v267_v61 = vld [vmem:[%s732_s4 + $0x10] sm:$0xff] }
  0x11   :  { %103 = vmatpush.msra.mxu2 %v516_v9  ;;  %127 = vmatpush.msra.mxu3 %v516_v9  ;;  %v266_v62 = vld [vmem:[%s732_s4 + $0x8] sm:$0xff]  ;;  %v265_v63 = vld [vmem:[%s732_s4] sm:$0xff] }
  0x12   :  { %80 = vmatpush.msra.mxu1 %v525_v10  ;;  %149 = vmatpush.msrb.mxu0 %v498_v7  ;;  %v341_v5 = vld [vmem:[%s733_s5] ss:$0 sm:$0xff] }
  0x13   :  { %104 = vmatpush.msra.mxu2 %v525_v10  ;;  %128 = vmatpush.msra.mxu3 %v525_v10 }
  0x14   :  { %81 = vmatpush.msra.mxu1 %v534_v11  ;;  %150 = vmatpush.msrb.mxu0 %v507_v8 }
  0x15   :  { %105 = vmatpush.msra.mxu2 %v534_v11  ;;  %129 = vmatpush.msra.mxu3 %v534_v11 }
  0x16   :  { %82 = vmatpush.msra.mxu1 %v543_v12  ;;  %151 = vmatpush.msrb.mxu0 %v516_v9 }
  0x17   :  { %106 = vmatpush.msra.mxu2 %v543_v12  ;;  %130 = vmatpush.msra.mxu3 %v543_v12 }
  0x18   :  { %83 = vmatpush.msra.mxu1 %v552_v13  ;;  %152 = vmatpush.msrb.mxu0 %v525_v10 }
  0x19   :  { %107 = vmatpush.msra.mxu2 %v552_v13  ;;  %131 = vmatpush.msra.mxu3 %v552_v13 }
  0x1a   :  { %84 = vmatpush.msra.mxu1 %v561_v14  ;;  %153 = vmatpush.msrb.mxu0 %v534_v11 }
  0x1b   :  { %108 = vmatpush.msra.mxu2 %v561_v14  ;;  %132 = vmatpush.msra.mxu3 %v561_v14 }
  0x1c   :  { %85 = vmatpush.msra.mxu1 %v570_v15  ;;  %154 = vmatpush.msrb.mxu0 %v543_v12 }
  0x1d   :  { %109 = vmatpush.msra.mxu2 %v570_v15  ;;  %133 = vmatpush.msra.mxu3 %v570_v15 }
  0x1e   :  { %86 = vmatpush.msra.mxu1 %v579_v16  ;;  %155 = vmatpush.msrb.mxu0 %v552_v13 }
  0x1f   :  { %110 = vmatpush.msra.mxu2 %v579_v16  ;;  %134 = vmatpush.msra.mxu3 %v579_v16 }
  0x20   :  { %87 = vmatpush.msra.mxu1 %v588_v17  ;;  %156 = vmatpush.msrb.mxu0 %v561_v14 }
  0x21   :  { %88 = vmatmul.f32.vlgmr.msra.gmra.mxu1 %v70_v18  ;;  %111 = vmatpush.msra.mxu2 %v588_v17 }
  0x22   :  { %135 = vmatpush.msra.mxu3 %v588_v17  ;;  %157 = vmatpush.msrb.mxu0 %v570_v15 }
  0x23   :  { %168 = vmatpush.msrb.mxu1 %v455_v0  ;;  %192 = vmatpush.msrb.mxu2 %v455_v0 }
  0x24   :  { %158 = vmatpush.msrb.mxu0 %v579_v16  ;;  %216 = vmatpush.msrb.mxu3 %v455_v0 }
  0x25   :  { %169 = vmatpush.msrb.mxu1 %v460_v1  ;;  %193 = vmatpush.msrb.mxu2 %v460_v1 }
  0x26   :  { %159 = vmatpush.msrb.mxu0 %v588_v17  ;;  %217 = vmatpush.msrb.mxu3 %v460_v1 }
  0x27   :  { %170 = vmatpush.msrb.mxu1 %v467_v2  ;;  %194 = vmatpush.msrb.mxu2 %v467_v2 }
  0x28   :  { %218 = vmatpush.msrb.mxu3 %v467_v2  ;;  %240 = vmatpush.msra.mxu0 %v455_v0 }
  0x29   :  { %171 = vmatpush.msrb.mxu1 %v478_v4  ;;  %195 = vmatpush.msrb.mxu2 %v478_v4 }
  0x2a   :  { %219 = vmatpush.msrb.mxu3 %v478_v4  ;;  %241 = vmatpush.msra.mxu0 %v460_v1 }
  0x2b   :  { %172 = vmatpush.msrb.mxu1 %v489_v6  ;;  %196 = vmatpush.msrb.mxu2 %v489_v6 }
  0x2c   :  { %220 = vmatpush.msrb.mxu3 %v489_v6  ;;  %242 = vmatpush.msra.mxu0 %v467_v2 }
  0x2d   :  { %173 = vmatpush.msrb.mxu1 %v498_v7  ;;  %197 = vmatpush.msrb.mxu2 %v498_v7 }
  0x2e   :  { %221 = vmatpush.msrb.mxu3 %v498_v7  ;;  %243 = vmatpush.msra.mxu0 %v478_v4 }
  0x2f   :  { %174 = vmatpush.msrb.mxu1 %v507_v8  ;;  %198 = vmatpush.msrb.mxu2 %v507_v8 }
  0x30   :  { %222 = vmatpush.msrb.mxu3 %v507_v8  ;;  %244 = vmatpush.msra.mxu0 %v489_v6 }
  0x31   :  { %175 = vmatpush.msrb.mxu1 %v516_v9  ;;  %199 = vmatpush.msrb.mxu2 %v516_v9 }
  0x32   :  { %223 = vmatpush.msrb.mxu3 %v516_v9  ;;  %245 = vmatpush.msra.mxu0 %v498_v7 }
  0x33   :  { %176 = vmatpush.msrb.mxu1 %v525_v10  ;;  %200 = vmatpush.msrb.mxu2 %v525_v10 }
  0x34   :  { %224 = vmatpush.msrb.mxu3 %v525_v10  ;;  %246 = vmatpush.msra.mxu0 %v507_v8 }
  0x35   :  { %177 = vmatpush.msrb.mxu1 %v534_v11  ;;  %201 = vmatpush.msrb.mxu2 %v534_v11 }
  0x36   :  { %225 = vmatpush.msrb.mxu3 %v534_v11  ;;  %247 = vmatpush.msra.mxu0 %v516_v9 }
  0x37   :  { %178 = vmatpush.msrb.mxu1 %v543_v12  ;;  %202 = vmatpush.msrb.mxu2 %v543_v12 }
  0x38   :  { %226 = vmatpush.msrb.mxu3 %v543_v12  ;;  %248 = vmatpush.msra.mxu0 %v525_v10 }
  0x39   :  { %179 = vmatpush.msrb.mxu1 %v552_v13  ;;  %203 = vmatpush.msrb.mxu2 %v552_v13 }
  0x3a   :  { %227 = vmatpush.msrb.mxu3 %v552_v13  ;;  %249 = vmatpush.msra.mxu0 %v534_v11 }
  0x3b   :  { %180 = vmatpush.msrb.mxu1 %v561_v14  ;;  %204 = vmatpush.msrb.mxu2 %v561_v14 }
  0x3c   :  { %228 = vmatpush.msrb.mxu3 %v561_v14  ;;  %250 = vmatpush.msra.mxu0 %v543_v12 }
  0x3d   :  { %181 = vmatpush.msrb.mxu1 %v570_v15  ;;  %205 = vmatpush.msrb.mxu2 %v570_v15 }
  0x3e   :  { %229 = vmatpush.msrb.mxu3 %v570_v15  ;;  %251 = vmatpush.msra.mxu0 %v552_v13 }
  0x3f   :  { %182 = vmatpush.msrb.mxu1 %v579_v16  ;;  %206 = vmatpush.msrb.mxu2 %v579_v16 }
  0x40   :  { %230 = vmatpush.msrb.mxu3 %v579_v16  ;;  %252 = vmatpush.msra.mxu0 %v561_v14 }
  0x41   :  { %183 = vmatpush.msrb.mxu1 %v588_v17  ;;  %207 = vmatpush.msrb.mxu2 %v588_v17 }
  0x42   :  { %231 = vmatpush.msrb.mxu3 %v588_v17  ;;  %253 = vmatpush.msra.mxu0 %v570_v15 }
  0x43   :  { %285 = vmatpush.msra.mxu1 %v280_v44 }
  0x44   :  { %254 = vmatpush.msra.mxu0 %v579_v16 }
  0x45   :  { %286 = vmatpush.msra.mxu1 %v279_v45 }
  0x46   :  { %255 = vmatpush.msra.mxu0 %v588_v17 }
  0x47   :  { %287 = vmatpush.msra.mxu1 %v278_v46 }
  0x49   :  { %288 = vmatpush.msra.mxu1 %v277_v47 }
  0x4b   :  { %289 = vmatpush.msra.mxu1 %v276_v48 }
  0x4d   :  { %290 = vmatpush.msra.mxu1 %v275_v49 }
  0x4f   :  { %291 = vmatpush.msra.mxu1 %v274_v50 }
  0x51   :  { %292 = vmatpush.msra.mxu1 %v273_v55 }
  0x53   :  { %293 = vmatpush.msra.mxu1 %v272_v56 }
  0x55   :  { %294 = vmatpush.msra.mxu1 %v271_v57 }
  0x57   :  { %295 = vmatpush.msra.mxu1 %v270_v58 }
  0x59   :  { %296 = vmatpush.msra.mxu1 %v269_v59 }
  0x5b   :  { %297 = vmatpush.msra.mxu1 %v268_v60 }
  0x5d   :  { %298 = vmatpush.msra.mxu1 %v267_v61 }
  0x5f   :  { %299 = vmatpush.msra.mxu1 %v266_v62 }
  0x61   :  { %300 = vmatpush.msra.mxu1 %v265_v63 }
  0x82   :  { %v50_v19 = vpop.f32.mrf.mxu0 }
  0x83   :  { %53 = vst [vmem:[#allocation2] sm:$0xff] %v50_v19 }
  0x8a   :  { %v71_v20 = vld [vmem:[#allocation2] sm:$0x1]  ;;  %v95_v24 = vld [vmem:[#allocation2 + $0x1] sm:$0x1]  ;;  %v119_v28 = vld [vmem:[#allocation2 + $0x2] sm:$0x1] }
  0x8b   :  { %v143_v32 = vld [vmem:[#allocation2 + $0x3] sm:$0x1]  ;;  %v167_v36 = vld [vmem:[#allocation2 + $0x4] sm:$0x1]  ;;  %v191_v40 = vld [vmem:[#allocation2 + $0x5] sm:$0x1] }
  0x8c   :  { %v215_v51 = vld [vmem:[#allocation2 + $0x6] sm:$0x1]  ;;  %v239_v0 = vld [vmem:[#allocation2 + $0x7] sm:$0x1] }
  0x9e   :  { %v89_v21 = vpop.f32.mrf.mxu1 }
  0x9f   :  { %v92_v22 = vadd.f32 %v89_v21, %v71_v20 }
  0xa1   :  { %342 = vtanh.f32 %v92_v22 }
  0xa7   :  { %v343_v23 = vpop.eup %342 }
  0xa8   :  { %94 = vst [vmem:[#allocation3] sm:$0x1] %v343_v23  ;;  %112 = vmatmul.f32.vlgmr.msra.gmra.mxu2 %v343_v23 }
 0x12b   :  { %v113_v25 = vpop.f32.mrf.mxu2 }
 0x12c   :  { %v116_v26 = vadd.f32 %v113_v25, %v95_v24 }
 0x12e   :  { %344 = vtanh.f32 %v116_v26 }
 0x134   :  { %v345_v27 = vpop.eup %344 }
 0x135   :  { %118 = vst [vmem:[#allocation3 + $0x1] sm:$0x1] %v345_v27  ;;  %136 = vmatmul.f32.vlgmr.msra.gmra.mxu3 %v345_v27 }
 0x1b8   :  { %v137_v29 = vpop.f32.mrf.mxu3 }
 0x1b9   :  { %v140_v30 = vadd.f32 %v137_v29, %v119_v28 }
 0x1bb   :  { %346 = vtanh.f32 %v140_v30 }
 0x1c1   :  { %v347_v31 = vpop.eup %346 }
 0x1c2   :  { %142 = vst [vmem:[#allocation3 + $0x2] sm:$0x1] %v347_v31  ;;  %160 = vmatmul.f32.vlgmr.msrb.gmra.mxu0 %v347_v31 }
 0x23f   :  { %v161_v33 = vpop.f32.mrf.mxu0 }
 0x240   :  { %v164_v34 = vadd.f32 %v161_v33, %v143_v32 }
 0x242   :  { %348 = vtanh.f32 %v164_v34 }
 0x248   :  { %v349_v35 = vpop.eup %348 }
 0x249   :  { %166 = vst [vmem:[#allocation3 + $0x3] sm:$0x1] %v349_v35  ;;  %184 = vmatmul.f32.vlgmr.msrb.gmra.mxu1 %v349_v35 }
 0x2c6   :  { %v185_v37 = vpop.f32.mrf.mxu1 }
 0x2c7   :  { %v188_v38 = vadd.f32 %v185_v37, %v167_v36 }
 0x2c9   :  { %350 = vtanh.f32 %v188_v38 }
 0x2cf   :  { %v351_v39 = vpop.eup %350 }
 0x2d0   :  { %190 = vst [vmem:[#allocation3 + $0x4] sm:$0x1] %v351_v39  ;;  %208 = vmatmul.f32.vlgmr.msrb.gmra.mxu2 %v351_v39 }
 0x353   :  { %v209_v41 = vpop.f32.mrf.mxu2 }
 0x354   :  { %v212_v42 = vadd.f32 %v209_v41, %v191_v40 }
 0x356   :  { %352 = vtanh.f32 %v212_v42 }
 0x35c   :  { %v353_v43 = vpop.eup %352 }
 0x35d   :  { %214 = vst [vmem:[#allocation3 + $0x5] sm:$0x1] %v353_v43  ;;  %232 = vmatmul.f32.vlgmr.msrb.gmra.mxu3 %v353_v43 }
 0x3e0   :  { %v233_v52 = vpop.f32.mrf.mxu3 }
 0x3e1   :  { %v236_v53 = vadd.f32 %v233_v52, %v215_v51 }
 0x3e3   :  { %354 = vtanh.f32 %v236_v53 }
 0x3e9   :  { %v355_v54 = vpop.eup %354 }
 0x3ea   :  { %238 = vst [vmem:[#allocation3 + $0x6] sm:$0x1] %v355_v54  ;;  %256 = vmatmul.f32.vlgmr.msra.gmra.mxu0 %v355_v54 }
 0x467   :  { %v257_v1 = vpop.f32.mrf.mxu0 }
 0x468   :  { %v260_v2 = vadd.f32 %v257_v1, %v239_v0 }
 0x46a   :  { %356 = vtanh.f32 %v260_v2 }
 0x470   :  { %v357_v3 = vpop.eup %356 }
 0x471   :  { %262 = vst [vmem:[#allocation3 + $0x7] sm:$0x1] %v357_v3 }
 0x472   :  { %263 = vst [vmem:[#allocation6] sm:$0x1] %v357_v3 }
 0x473   :  { %327 = dma.vmem_to_hbm [thread:$0]  %s323_s16, 16, %s325_s19, [#allocation7]  }
 0x478   :  { %v264_v4 = vld [vmem:[#allocation3] sm:$0xff] }
 0x479   :  { %301 = vmatmul.f32.vlgmr.msra.gmra.mxu1 %v264_v4 }
 0x4f6   :  { %v302_v6 = vpop.f32.mrf.mxu1 }
 0x4f7   :  { %v303_v7 = vadd.f32 %v341_v5, %v302_v6 }
 0x4f9   :  { %305 = vst.msk [vmem:[#allocation4] sm:$0xff] %vm29_vm0, %v303_v7 }
 0x4fa   :  { %316 = dma.vmem_to_hbm [thread:$0]  %s312_s22, 128, %s314_s25, [#allocation5]  }
 0x4fb   :  { %406 = dma.done.wait [#allocation5], 128  }
 0x4fc   :  { %407 = vsyncadd [#allocation5], 4294967168 }
 0x4fd   :  { %408 = dma.done.wait [#allocation7], 16  }
 0x4fe   :  { %409 = vsyncadd [#allocation7], 4294967280 }
 0x4ff   :  { %336 = vsyncpa [#allocation5], 1 }
 0x500   :  { %337 = vsyncpa [#allocation7], 1 }

</bundles_post_ra>
